<compile_context>
chip_gen: v6e
topology: v6e:2x2x1
jax: 0.10.0
libtpu: 0.0.40
codegen_flags: <defaults>
</compile_context>

<pallas_src>
import functools

import jax
import jax.numpy as jnp
from jax.experimental import pallas as pl
from jax.experimental.pallas import tpu as pltpu


def _round_up(n, m):
    return ((n + m - 1) // m) * m


def _critic_kernel(x_ref, w1_ref, b1_ref, w2_ref, b2_ref, w3_ref, b3_ref, out_ref):
    # Layer 1: [TB, D](bf16) @ [D, H](bf16) -> f32 acc, +bias, tanh (f32).
    h1 = jnp.dot(x_ref[...], w1_ref[...], preferred_element_type=jnp.float32)
    h1 = jnp.tanh(h1 + b1_ref[...])
    # Layer 2: cast activations to bf16 for the native MXU path, f32 acc.
    h2 = jnp.dot(h1.astype(w2_ref.dtype), w2_ref[...],
                 preferred_element_type=jnp.float32)
    h2 = jnp.tanh(h2 + b2_ref[...])
    # Value head (out dim = 1): VPU multiply + lane reduction instead of a
    # 1-column MXU matmul.  w3 is stored as [1, H] f32.
    v = jnp.sum(h2 * w3_ref[...], axis=-1, keepdims=True) + b3_ref[...]
    out_ref[...] = v.astype(out_ref.dtype)


@functools.partial(jax.jit, static_argnames=("block_batch",))
def ppo_critic_forward(x, params, *, block_batch=512):
    """x: [B, input_dim] float32. params: dict of w1,b1,w2,b2,w3,b3.

    Weights stored as [in, out]; w3 stored as [1, hidden] (row vector).
    """
    w1 = params["w1"].astype(jnp.bfloat16)
    w2 = params["w2"].astype(jnp.bfloat16)
    b1 = params["b1"].astype(jnp.float32)
    b2 = params["b2"].astype(jnp.float32)
    w3 = params["w3"].astype(jnp.float32)   # [1, H] -- used on the VPU, keep f32
    b3 = params["b3"].astype(jnp.float32)   # [1, 1]

    B, D = x.shape
    H = w1.shape[1]

    # Batch tile: multiple of 8 sublanes, capped at block_batch.  For the tiny
    # feature dims here even TB=512 is only ~16 KiB of bf16 x-tile per buffer,
    # far under the scoped VMEM default on every generation (v5e 16 MiB /
    # v6e 32 MiB / v7x 32 MiB of 64 MiB physical), so no vmem_limit override
    # is needed.
    tb = min(block_batch, _round_up(B, 8))
    tb = _round_up(tb, 8)
    b_pad = _round_up(B, tb)

    xb = x.astype(jnp.bfloat16)
    if b_pad != B:
        xb = jnp.pad(xb, ((0, b_pad - B), (0, 0)))

    grid = (pl.cdiv(b_pad, tb),)

    out = pl.pallas_call(
        _critic_kernel,
        out_shape=jax.ShapeDtypeStruct((b_pad, 1), jnp.float32),
        grid=grid,
        in_specs=[
            pl.BlockSpec((tb, D), lambda i: (i, 0)),   # x: tiled over batch
            pl.BlockSpec((D, H), lambda i: (0, 0)),    # w1: resident
            pl.BlockSpec((1, H), lambda i: (0, 0)),    # b1: resident
            pl.BlockSpec((H, H), lambda i: (0, 0)),    # w2: resident
            pl.BlockSpec((1, H), lambda i: (0, 0)),    # b2: resident
            pl.BlockSpec((1, H), lambda i: (0, 0)),    # w3 (row): resident
            pl.BlockSpec((1, 1), lambda i: (0, 0)),    # b3: resident
        ],
        out_specs=pl.BlockSpec((tb, 1), lambda i: (i, 0)),
        compiler_params=pltpu.CompilerParams(
            dimension_semantics=("parallel",),
        ),
    )(xb, w1, b1, w2, b2, w3, b3)

    return out[:B]


def init_params(key, input_dim, hidden_dim):
    """Deterministic init; W1/W2 stored [in, out], w3 stored [1, hidden]."""
    k1, k2, k3, k4, k5, k6 = jax.random.split(key, 6)

    def uniform_init(k, shape, fan_in):
        bound = 1.0 / jnp.sqrt(fan_in)
        return jax.random.uniform(k, shape, jnp.float32, -bound, bound)

    return {
        "w1": uniform_init(k1, (input_dim, hidden_dim), input_dim),
        "b1": uniform_init(k2, (1, hidden_dim), input_dim),
        "w2": uniform_init(k3, (hidden_dim, hidden_dim), hidden_dim),
        "b2": uniform_init(k4, (1, hidden_dim), hidden_dim),
        "w3": uniform_init(k5, (1, hidden_dim), hidden_dim),  # value-head row
        "b3": uniform_init(k6, (1, 1), hidden_dim),
    }


def reference_forward(x, p):
    """Pure-JAX f32 reference (PyTorch semantics)."""
    h1 = jnp.tanh(x @ p["w1"] + p["b1"])
    h2 = jnp.tanh(h1 @ p["w2"] + p["b2"])
    return h2 @ p["w3"].T + p["b3"]


if __name__ == "__main__":
    key = jax.random.PRNGKey(0)
    k_x, k_p = jax.random.split(key)

    # Small shapes consistent with the module; batch deliberately NOT a
    # multiple of the tile to exercise padding + multi-step grid.
    batch, input_dim, hidden_dim = 20, 16, 32
    x = jax.random.normal(k_x, (batch, input_dim), jnp.float32)
    params = init_params(k_p, input_dim, hidden_dim)

    # Small tile for the demo so the grid has several steps; production PPO
    # rollouts would use the default block_batch=512.
    value = ppo_critic_forward(x, params, block_batch=8)
    value = jax.block_until_ready(value)

    ref = reference_forward(x, params)
    assert value.shape == (batch, 1), value.shape
    # bf16 inputs/weights vs f32 reference -> loosened tolerance.
    assert jnp.allclose(value, ref, atol=5e-2, rtol=5e-2), (
        "mismatch vs reference: max abs diff = "
        f"{float(jnp.max(jnp.abs(value - ref)))}"
    )

    print("KERNEL_OK")
</pallas_src>

<mosaic_0001>
module attributes {stable_mosaic.version = 11 : i64} {
  func.func @_critic_kernel(%arg0: i32, %arg1: memref<8x16xbf16, #tpu.memory_space<vmem>>, %arg2: memref<16x32xbf16, #tpu.memory_space<vmem>>, %arg3: memref<1x32xf32, #tpu.memory_space<vmem>>, %arg4: memref<32x32xbf16, #tpu.memory_space<vmem>>, %arg5: memref<1x32xf32, #tpu.memory_space<vmem>>, %arg6: memref<1x32xf32, #tpu.memory_space<vmem>>, %arg7: memref<1x1xf32, #tpu.memory_space<vmem>>, %arg8: memref<8x1xf32, #tpu.memory_space<vmem>>) attributes {dimension_semantics = [#tpu.dimension_semantics<parallel>], iteration_bounds = array<i64: 3>, scalar_prefetch = 0 : i64, scratch_operands = 0 : i64, tpu.core_type = #tpu.core_type<tc>, window_params = [{transform_indices = @transform_0, window_bounds = array<i64: 8, 16>}, {pipeline_mode = #tpu.pipeline_mode<synchronous>, transform_indices = @transform_1, window_bounds = array<i64: 16, 32>}, {pipeline_mode = #tpu.pipeline_mode<synchronous>, transform_indices = @transform_2, window_bounds = array<i64: 1, 32>}, {pipeline_mode = #tpu.pipeline_mode<synchronous>, transform_indices = @transform_3, window_bounds = array<i64: 32, 32>}, {pipeline_mode = #tpu.pipeline_mode<synchronous>, transform_indices = @transform_4, window_bounds = array<i64: 1, 32>}, {pipeline_mode = #tpu.pipeline_mode<synchronous>, transform_indices = @transform_5, window_bounds = array<i64: 1, 32>}, {pipeline_mode = #tpu.pipeline_mode<synchronous>, transform_indices = @transform_6, window_bounds = array<i64: 1, 1>}, {transform_indices = @transform_7, window_bounds = array<i64: 8, 1>}]} {
    %c0 = arith.constant 0 : index
    %c0_0 = arith.constant 0 : index
    %0 = vector.load %arg1[%c0, %c0_0] : memref<8x16xbf16, #tpu.memory_space<vmem>>, vector<8x16xbf16>
    %c0_1 = arith.constant 0 : index
    %c0_2 = arith.constant 0 : index
    %1 = vector.load %arg2[%c0_1, %c0_2] : memref<16x32xbf16, #tpu.memory_space<vmem>>, vector<16x32xbf16>
    %cst = arith.constant dense<0.000000e+00> : vector<8x32xf32>
    %2 = tpu.matmul %0, %1, %cst {dimension_numbers = #tpu.dot_dimension_numbers<[1], [0], [0], [1], [0, 0, 1, 1], [], []>} : vector<8x16xbf16>, vector<16x32xbf16>, vector<8x32xf32> -> vector<8x32xf32>
    %c0_3 = arith.constant 0 : index
    %c0_4 = arith.constant 0 : index
    %3 = vector.load %arg3[%c0_3, %c0_4] : memref<1x32xf32, #tpu.memory_space<vmem>>, vector<1x32xf32>
    %4 = vector.broadcast %3 : vector<1x32xf32> to vector<8x32xf32>
    %5 = arith.addf %2, %4 : vector<8x32xf32>
    %6 = math.tanh %5 : vector<8x32xf32>
    %7 = arith.truncf %6 : vector<8x32xf32> to vector<8x32xbf16>
    %c0_5 = arith.constant 0 : index
    %c0_6 = arith.constant 0 : index
    %8 = vector.load %arg4[%c0_5, %c0_6] : memref<32x32xbf16, #tpu.memory_space<vmem>>, vector<32x32xbf16>
    %cst_7 = arith.constant dense<0.000000e+00> : vector<8x32xf32>
    %9 = tpu.matmul %7, %8, %cst_7 {dimension_numbers = #tpu.dot_dimension_numbers<[1], [0], [0], [1], [0, 0, 1, 1], [], []>} : vector<8x32xbf16>, vector<32x32xbf16>, vector<8x32xf32> -> vector<8x32xf32>
    %c0_8 = arith.constant 0 : index
    %c0_9 = arith.constant 0 : index
    %10 = vector.load %arg5[%c0_8, %c0_9] : memref<1x32xf32, #tpu.memory_space<vmem>>, vector<1x32xf32>
    %11 = vector.broadcast %10 : vector<1x32xf32> to vector<8x32xf32>
    %12 = arith.addf %9, %11 : vector<8x32xf32>
    %13 = math.tanh %12 : vector<8x32xf32>
    %c0_10 = arith.constant 0 : index
    %c0_11 = arith.constant 0 : index
    %14 = vector.load %arg6[%c0_10, %c0_11] : memref<1x32xf32, #tpu.memory_space<vmem>>, vector<1x32xf32>
    %15 = vector.broadcast %14 : vector<1x32xf32> to vector<8x32xf32>
    %16 = arith.mulf %13, %15 : vector<8x32xf32>
    %cst_12 = arith.constant dense<0.000000e+00> : vector<8xf32>
    %17 = vector.multi_reduction <add>, %16, %cst_12 [1] : vector<8x32xf32> to vector<8xf32>
    %18 = vector.shape_cast %17 : vector<8xf32> to vector<8x1xf32>
    %c0_13 = arith.constant 0 : index
    %c0_14 = arith.constant 0 : index
    %19 = vector.load %arg7[%c0_13, %c0_14] : memref<1x1xf32, #tpu.memory_space<vmem>>, vector<1x1xf32>
    %20 = vector.broadcast %19 : vector<1x1xf32> to vector<8x1xf32>
    %21 = arith.addf %18, %20 : vector<8x1xf32>
    %c0_15 = arith.constant 0 : index
    %c0_16 = arith.constant 0 : index
    %22 = vector.load %arg8[%c0_15, %c0_16] : memref<8x1xf32, #tpu.memory_space<vmem>>, vector<8x1xf32>
    tpu.vector_store %arg8[%c0_15, %c0_16], %21 {strides = array<i32>} : memref<8x1xf32, #tpu.memory_space<vmem>>, vector<8x1xf32>,
    return
  }
  func.func @transform_0(%arg0: i32) -> (i32, i32) {
    %c0_i32 = arith.constant 0 : i32
    %c0_i32_0 = arith.constant 0 : i32
    return %arg0, %c0_i32 : i32, i32
  }
  func.func @transform_1(%arg0: i32) -> (i32, i32) {
    %c0_i32 = arith.constant 0 : i32
    %c0_i32_0 = arith.constant 0 : i32
    %c0_i32_1 = arith.constant 0 : i32
    return %c0_i32, %c0_i32_0 : i32, i32
  }
  func.func @transform_2(%arg0: i32) -> (i32, i32) {
    %c0_i32 = arith.constant 0 : i32
    %c0_i32_0 = arith.constant 0 : i32
    %c0_i32_1 = arith.constant 0 : i32
    return %c0_i32, %c0_i32_0 : i32, i32
  }
  func.func @transform_3(%arg0: i32) -> (i32, i32) {
    %c0_i32 = arith.constant 0 : i32
    %c0_i32_0 = arith.constant 0 : i32
    %c0_i32_1 = arith.constant 0 : i32
    return %c0_i32, %c0_i32_0 : i32, i32
  }
  func.func @transform_4(%arg0: i32) -> (i32, i32) {
    %c0_i32 = arith.constant 0 : i32
    %c0_i32_0 = arith.constant 0 : i32
    %c0_i32_1 = arith.constant 0 : i32
    return %c0_i32, %c0_i32_0 : i32, i32
  }
  func.func @transform_5(%arg0: i32) -> (i32, i32) {
    %c0_i32 = arith.constant 0 : i32
    %c0_i32_0 = arith.constant 0 : i32
    %c0_i32_1 = arith.constant 0 : i32
    return %c0_i32, %c0_i32_0 : i32, i32
  }
  func.func @transform_6(%arg0: i32) -> (i32, i32) {
    %c0_i32 = arith.constant 0 : i32
    %c0_i32_0 = arith.constant 0 : i32
    %c0_i32_1 = arith.constant 0 : i32
    return %c0_i32, %c0_i32_0 : i32, i32
  }
  func.func @transform_7(%arg0: i32) -> (i32, i32) {
    %c0_i32 = arith.constant 0 : i32
    %c0_i32_0 = arith.constant 0 : i32
    return %arg0, %c0_i32 : i32, i32
  }
}

</mosaic_0001>

<bundles_post_ra>
// kernel: ppo_critic_forward.1
= control target key start
LH: loop header
LB: loop body
LE: loop exit
PB: predicated region body
PF: predicated region fallthrough
CT: control target
= control target key end

     0   :  { %s588_s26 = smov 0   ;;  %s627_s0 = inlined_call_operand.vmem [shape: bf16[24,16], index: 0, kind: input, shape index: {}]   ;;  %s628_s1 = inlined_call_operand.vmem [shape: bf16[16,32], index: 1, kind: input, shape index: {}]   ;;  %s629_s2 = inlined_call_operand.vmem [shape: f32[1,32], index: 2, kind: input, shape index: {}]   ;;  %s630_s3 = inlined_call_operand.vmem [shape: bf16[32,32], index: 3, kind: input, shape index: {}]   ;;  %s631_s4 = inlined_call_operand.vmem [shape: f32[1,32], index: 4, kind: input, shape index: {}]   ;;  %s632_s5 = inlined_call_operand.vmem [shape: f32[1,32], index: 5, kind: input, shape index: {}]   ;;  %s633_s6 = inlined_call_operand.<no memory space> [shape: f32[1,1], index: 6, kind: input, shape index: {}]   ;;  %s634_s7 = inlined_call_operand.vmem [shape: f32[24,1], index: 7, kind: output, shape index: {}]  }
   0x1   :  { %v12_v0 = vstv %s633_s6 }
   0x2   :  { %13 = vst [vmem:[#allocation2] sm:$0x1] %v12_v0 }
   0x3 LB: > { %s481_s27 = sadd.s32 4294967295, %s541_s26   ;;  %p485_p0 = scmp.ge.s32.totalorder %s541_s26, 1  ;;  %s541_s26 = sphi %s588_s26, %s19_s26  }
   0x4   : > { %p238_p1 = scmp.lt.s32.totalorder %s541_s26, 4 }
   0x6   : > { %p239_p2 = pnand %p485_p0, %p238_p1 }
   0x7   : > { %p268_p3 = scmp.lt.s32.totalorder (!%p239_p2), %s481_s27, 2 }
   0x8   : > { %242 = sbr.rel (%p239_p2) target bundleno = 582 (0x246), region = 48 }
   0xd   : > { %v528_v1 = vld [vmem:[%s628_s1] sm:$0xff]   ;;  %v543_v2 = vmov 0.0   ;;  %vm544_vm0 = vmmov 0   ;;  %s636_s27 = smov (!%p268_p3, %s481_s27), 2  ;;  %vm293_vm1 = vcmask 130048   ;;  %v529_v4 = vld [vmem:[%s630_s3 + $0x8] sm:$0xff]  }
   0xe   : > { %504 = vmatprep.subr.bf16.mxu0 %v543_v2  ;;  %510 = vmatprep.subr.bf16.mxu1 %v543_v2  ;;  %s486_s6 = sshll.u32 %s636_s27, 2  ;;  %v530_v5 = vld [vmem:[%s630_s3] sm:$0xff]   ;;  %vm362_vm2 = vcmask 261120   ;;  %s487_s20 = sshll.u32 %s636_s27, 3  ;;  %vm426_vm3 = vcmask 7168  }
   0xf   : > { %505 = vmatpush3.bf16.msra.mxu0 %v528_v1  ;;  %506 = vmatprep.mubr.msk.bf16.mxu0 %vm544_vm0, %v543_v2  ;;  %s271_s9 = scalar_lea.vmem %s627_s0, %s486_s6  ;;  %v488_v6 = vld [vmem:[%s629_s2] ss:$0 sm:$0xff]  ;;  %s275_s23 = scalar_lea.vmem %s634_s7, %s487_s20 }
  0x10   : > { %514 = vmatprep.mubr.msk.bf16.mxu1 %vm544_vm0, %v543_v2  ;;  %v277_v3 = vld [vmem:[%s271_s9] sm:$0xf]  ;;  %511 = vmatpush3.bf16.msra.mxu1 %v529_v4 }
  0x11   : > { %512 = vmatprep.subr.bf16.mxu1 %v543_v2  ;;  %v491_v14 = vld [vmem:[%s631_s4] ss:$0 sm:$0xff] }
  0x12   : > { %507 = vmatmul.mubr.msk.bf16.vlgmr.msra.gmra.mxu0 %vm293_vm1, %v277_v3  ;;  %v495_v20 = vld [vmem:[%s632_s5] ss:$0 sm:$0xff] }
  0x13   : > { %v496_v24 = vld [vmem:[#allocation2] ss:$0 sm:$0xff] }
  0x14   : > { %513 = vmatpush3.bf16.msra.mxu1 %v530_v5 }
  0xd2   : > { %v331_v7 = vpop.f32.mrf.mxu0 }
  0xd3   : > { %v332_v8 = vadd.f32 %v488_v6, %v331_v7 }
  0xd4   : > { %v508_v9 = vpop.f32.mrf.mxu0 }
  0xd5   : > { %531 = vtanh.f32 %v332_v8 }
  0xd6   : > { %v334_v10 = vpop.f32.mrf.mxu0 }
  0xd8   : > { %v509_v11 = vpop.f32.mrf.mxu0 }
  0xe2   : > { %v532_v12 = vpop.eup %531 }
  0xe3   : > { %v338_v13 = vpack.c.bf16 %v532_v12, %v532_v12 }
  0xe5   : > { %515 = vmatmul.mubr.msk.bf16.vlgmr.msra.gmra.mxu1 %vm362_vm2, %v338_v13 }
 0x1a5   : > { %v400_v15 = vpop.f32.mrf.mxu1 }
 0x1a6   : > { %v401_v16 = vadd.f32 %v491_v14, %v400_v15 }
 0x1a7   : > { %v516_v17 = vpop.f32.mrf.mxu1 }
 0x1a8   : > { %533 = vtanh.f32 %v401_v16 }
 0x1a9   : > { %v403_v18 = vpop.f32.mrf.mxu1 }
 0x1ab   : > { %v517_v19 = vpop.f32.mrf.mxu1 }
 0x1b5   : > { %v534_v21 = vpop.eup %533 }
 0x1b6   : > { %v414_v22 = vmul.f32 %v534_v21, %v495_v20 }
 0x1b8   : > { %v415_v23 = vsel %vm362_vm2, %v414_v22, 0.0 }
 0x1b9   : > { %416 = vadd.xlane.f32.xlu0 %v415_v23 }
 0x242   : > { %v417_v25 = vpop.xlane.xlu0 %416 }
 0x243   : > { %v425_v26 = vadd.f32 %v496_v24, %v417_v25 }
 0x245   : > { %427 = vst.msk [vmem:[%s275_s23] sm:$0xff] %vm426_vm3, %v425_v26 }
 0x246 PF: > { %s19_s26 = sadd.s32 1, %s541_s26  }
 0x247   : > { %p16_p4 = scmp.ge.s32.totalorder %s19_s26, 5  }
 0x249   :  { %18 = sbr.rel (!%p16_p4) target bundleno = 3 (0x3), region = 78 }

</bundles_post_ra>
